<compile_context>
chip_gen: v7x
topology: tpu7x:2x2x1
jax: 0.10.0
libtpu: 0.0.40
codegen_flags: <defaults>
</compile_context>

<pallas_src>
import functools

import jax
import jax.numpy as jnp
import numpy as np
from jax.experimental import pallas as pl
from jax.experimental.pallas import tpu as pltpu


def _round_up(x, m):
    return (x + m - 1) // m * m


def _conv1d_kernel(x_ref, w_ref, b_ref, o_ref, *, n_groups):
    # x_ref : (1, stride_eff, C_in_pad, cols)  phase-decomposed input block
    #         x_ref[0, p, c, bt*cpb + j] == x_pad[batch, c, j*stride + p]
    # w_ref : (n_groups, C_out_pad, stride_eff*C_in_pad)  grouped flattened weight
    #         w_ref[q, o, p*C_in_pad + c] == w[o, c, q*stride_eff + p] (zero-padded taps)
    # b_ref : (C_out_pad, 1)                   f32 bias
    # o_ref : (1, C_out_pad, cols)             fused (batch, column) lane axis
    _, s_eff, c_in_pad, cols = x_ref.shape

    # Free sublane stack: C_in_pad is a multiple of the dtype's sublane tile.
    x0 = x_ref[0].reshape(s_eff * c_in_pad, cols)

    # Group 0 (taps k in [0, stride)): one fused MXU dot with f32 accumulation.
    acc = jnp.dot(w_ref[0], x0, preferred_element_type=jnp.float32)

    # Groups q >= 1: same slab shifted left by q columns via an XLU lane rotation.
    # x_q[:, j] = x0[:, (j + q) % cols]; the wrap-around only touches garbage output
    # columns (j >= L_out), which the wrapper slices away.
    for q in range(1, n_groups):
        x_q = pltpu.roll(x0, shift=cols - q, axis=1)
        acc = acc + jnp.dot(w_ref[q], x_q, preferred_element_type=jnp.float32)

    # Minimal f32 epilogue (bias broadcast + cast), one unmasked lane-dense store.
    o_ref[0] = (acc + b_ref[...]).astype(o_ref.dtype)


def conv1d_pallas(x, weight, bias, *, stride, padding, compute_dtype=None,
                  vmem_block_budget_bytes=24 * 1024 * 1024):
    """F.conv1d(x, weight, bias, stride, padding, dilation=1, groups=1)."""
    n, c_in, l_in = x.shape
    c_out, c_in_w, k_size = weight.shape
    assert c_in_w == c_in, "groups=1 requires weight C_in == input C_in"

    out_dtype = x.dtype
    cdt = jnp.dtype(compute_dtype) if compute_dtype is not None else jnp.dtype(x.dtype)

    l_full = l_in + 2 * padding
    l_out = (l_full - k_size) // stride + 1
    assert l_out > 0, "output length must be positive"

    # Phase decomposition: tap k = q*stride_eff + p.  Only min(stride, K) phases are
    # ever read; unused phases are never handed to the kernel (no wasted DMA/VMEM).
    stride_eff = min(stride, k_size)
    n_groups = -(-k_size // stride_eff)           # ceil(K / stride_eff)
    qmax = n_groups - 1
    l_groups = -(-l_full // stride)               # ceil(l_full / stride)
    # Tap-halo invariant: a real output column j (< l_out) in group q reads column
    # j + q, which must stay inside this batch's own (zero-padded) column range.
    assert l_out + qmax <= l_groups, "tap halo would leak across batch boundaries"

    # Sublane packing multiple of the compute dtype (f32: 8, bf16: 16, int8/fp8: 32).
    sub = max(8, 32 // cdt.itemsize)
    c_in_pad = _round_up(c_in, sub)
    c_out_pad = _round_up(c_out, sub)

    # Per-batch lane width: multiple of 128 so stores are unmasked, per-batch offsets
    # stay lane-tile aligned, and the roll halo lands in this batch's zero padding.
    cpb = _round_up(l_groups, 128)

    # ---- Block sizing (VMEM budget, portable to v7x's 64 MiB) ----------------------
    x_item = cdt.itemsize
    o_item = jnp.dtype(out_dtype).itemsize
    kc = stride_eff * c_in_pad
    w_bytes = n_groups * c_out_pad * kc * x_item
    b_bytes = c_out_pad * 4
    bytes_per_col = 2 * (stride_eff * c_in_pad * x_item + c_out_pad * o_item)  # 2x: dbl-buf
    max_cols = max(cpb, (vmem_block_budget_bytes - w_bytes - b_bytes) // max(1, bytes_per_col))
    # TODO(synk): add an intra-batch column grid axis for very long sequences where a
    # single batch's cpb already exceeds the per-step VMEM budget.

    # Fold batches onto the lane axis: target ~512 fused columns (large-tile roofline)
    # while keeping >= min(N, 4) grid steps so both v7x TCs get work and the BlockSpec
    # pipeline has iterations to double-buffer.
    min_steps = min(n, 4)
    target_cols = 512
    b_tile = 1
    for d in range(1, n + 1):
        if n % d != 0:
            continue
        if n // d < min_steps or d * cpb > max_cols or d * cpb > max(target_cols, cpb):
            break
        b_tile = d
    n_blocks = n // b_tile
    cols_blk = b_tile * cpb

    # ---- Weight / bias re-layout (tiny, one-time) ----------------------------------
    k_pad = n_groups * stride_eff
    w_p = jnp.pad(weight, ((0, c_out_pad - c_out), (0, c_in_pad - c_in),
                           (0, k_pad - k_size)))
    w_g = w_p.reshape(c_out_pad, c_in_pad, n_groups, stride_eff)
    w_g = w_g.transpose(2, 0, 3, 1).reshape(n_groups, c_out_pad, kc).astype(cdt)
    b2 = jnp.pad(bias, (0, c_out_pad - c_out)).reshape(c_out_pad, 1).astype(jnp.float32)

    # ---- Input re-layout: one pad + one fused reshape/slice/transpose --------------
    x_c = x.astype(cdt)
    x_pad = jnp.pad(x_c, ((0, 0), (0, c_in_pad - c_in),
                          (padding, cpb * stride - l_in - padding)))
    x_b = x_pad.reshape(n_blocks, b_tile, c_in_pad, cpb, stride)[:, :, :, :, :stride_eff]
    x_b = x_b.transpose(0, 4, 2, 1, 3).reshape(n_blocks, stride_eff, c_in_pad, cols_blk)

    # ---- Kernel launch ---------------------------------------------------------------
    x_blk_bytes = stride_eff * c_in_pad * cols_blk * x_item
    o_blk_bytes = c_out_pad * cols_blk * o_item
    vmem_need = 2 * (x_blk_bytes + o_blk_bytes) + w_bytes + b_bytes + (1 << 20)
    vmem_limit = int(min(max(vmem_need, 32 * 1024 * 1024), 56 * 1024 * 1024))

    cost = pl.CostEstimate(
        flops=2 * n * c_out * c_in * k_size * l_out,
        transcendentals=0,
        bytes_accessed=int(x_b.size) * x_item + int(w_g.size) * x_item
        + n * c_out * l_out * o_item,
    )

    kernel = functools.partial(_conv1d_kernel, n_groups=n_groups)

    out_b = pl.pallas_call(
        kernel,
        out_shape=jax.ShapeDtypeStruct((n_blocks, c_out_pad, cols_blk), out_dtype),
        grid_spec=pltpu.PrefetchScalarGridSpec(
            num_scalar_prefetch=0,
            grid=(n_blocks,),
            in_specs=[
                pl.BlockSpec((1, stride_eff, c_in_pad, cols_blk), lambda b: (b, 0, 0, 0)),
                pl.BlockSpec((n_groups, c_out_pad, kc), lambda b: (0, 0, 0)),
                pl.BlockSpec((c_out_pad, 1), lambda b: (0, 0)),
            ],
            out_specs=pl.BlockSpec((1, c_out_pad, cols_blk), lambda b: (b, 0, 0)),
        ),
        compiler_params=pltpu.CompilerParams(
            dimension_semantics=("parallel",),
            vmem_limit_bytes=vmem_limit,
        ),
        cost_estimate=cost,
    )(x_b, w_g, b2)

    # Layout plumbing back to (N, C_out, L_out); drops padded channels / garbage cols.
    out = out_b.reshape(n_blocks, c_out_pad, b_tile, cpb).transpose(0, 2, 1, 3)
    out = out.reshape(n, c_out_pad, cpb)[:, :c_out, :l_out]
    return out


if __name__ == "__main__":
    # Module hyper-parameters (what Conv1d.__init__ takes).
    in_channel, out_channel = 4, 8
    kernel_size, stride, padding = 3, 2, 1
    batch, length = 2, 16

    key = jax.random.PRNGKey(0)
    kx, kw, kb = jax.random.split(key, 3)

    x = jax.random.normal(kx, (batch, in_channel, length), dtype=jnp.float32)
    weight = jax.random.normal(
        kw, (out_channel, in_channel, kernel_size), dtype=jnp.float32) * 0.1
    bias = jax.random.normal(kb, (out_channel,), dtype=jnp.float32) * 0.1

    # Reference: XLA conv with identical F.conv1d semantics.
    ref = jax.lax.conv_general_dilated(
        x, weight,
        window_strides=(stride,),
        padding=[(padding, padding)],
        dimension_numbers=("NCH", "OIH", "NCH"),
    ) + bias.reshape(1, out_channel, 1)
    ref = jax.block_until_ready(ref)

    # f32 compute path (exact numerics).
    out = conv1d_pallas(x, weight, bias, stride=stride, padding=padding)
    out = jax.block_until_ready(out)
    np.testing.assert_allclose(np.asarray(out), np.asarray(ref), rtol=1e-5, atol=1e-5)

    # bf16 compute path (f32 accumulation): halves HBM/VMEM traffic and doubles MXU
    # throughput on v6e/v7x.  Looser tolerance = expected precision loss, not a bug.
    out_bf16 = conv1d_pallas(x, weight, bias, stride=stride, padding=padding,
                             compute_dtype=jnp.bfloat16)
    out_bf16 = jax.block_until_ready(out_bf16)
    np.testing.assert_allclose(np.asarray(out_bf16), np.asarray(ref),
                               rtol=5e-2, atol=5e-2)

    print("KERNEL_OK")
</pallas_src>

<mosaic_0001>
module attributes {stable_mosaic.version = 11 : i64} {
  func.func @_conv1d_kernel(%arg0: i32, %arg1: memref<1x2x8x128xf32, #tpu.memory_space<vmem>>, %arg2: memref<2x8x16xf32, #tpu.memory_space<vmem>>, %arg3: memref<8x1xf32, #tpu.memory_space<vmem>>, %arg4: memref<1x8x128xf32, #tpu.memory_space<vmem>>) attributes {dimension_semantics = [#tpu.dimension_semantics<parallel>], iteration_bounds = array<i64: 2>, scalar_prefetch = 0 : i64, scratch_operands = 0 : i64, tpu.core_type = #tpu.core_type<tc>, window_params = [{transform_indices = @transform_0, window_bounds = array<i64: 1, 2, 8, 128>}, {pipeline_mode = #tpu.pipeline_mode<synchronous>, transform_indices = @transform_1, window_bounds = array<i64: 2, 8, 16>}, {pipeline_mode = #tpu.pipeline_mode<synchronous>, transform_indices = @transform_2, window_bounds = array<i64: 8, 1>}, {transform_indices = @transform_3, window_bounds = array<i64: 1, 8, 128>}]} {
    %c0 = arith.constant 0 : index
    %c0_0 = arith.constant 0 : index
    %c0_1 = arith.constant 0 : index
    %c0_2 = arith.constant 0 : index
    %0 = vector.load %arg1[%c0, %c0_0, %c0_1, %c0_2] : memref<1x2x8x128xf32, #tpu.memory_space<vmem>>, vector<1x2x8x128xf32>
    %1 = vector.shape_cast %0 : vector<1x2x8x128xf32> to vector<2x8x128xf32>
    %2 = vector.shape_cast %1 : vector<2x8x128xf32> to vector<16x128xf32>
    %c0_3 = arith.constant 0 : index
    %c0_4 = arith.constant 0 : index
    %c0_5 = arith.constant 0 : index
    %3 = vector.load %arg2[%c0_3, %c0_4, %c0_5] : memref<2x8x16xf32, #tpu.memory_space<vmem>>, vector<1x8x16xf32>
    %4 = vector.shape_cast %3 : vector<1x8x16xf32> to vector<8x16xf32>
    %cst = arith.constant dense<0.000000e+00> : vector<8x128xf32>
    %5 = tpu.matmul %4, %2, %cst {dimension_numbers = #tpu.dot_dimension_numbers<[1], [0], [0], [1], [0, 0, 1, 1], [], []>} : vector<8x16xf32>, vector<16x128xf32>, vector<8x128xf32> -> vector<8x128xf32>
    %c127_i32 = arith.constant 127 : i32
    %6 = tpu.dynamic_rotate %2 by %c127_i32 dim 1 : vector<16x128xf32>, i32 -> vector<16x128xf32>
    %c1 = arith.constant 1 : index
    %c0_6 = arith.constant 0 : index
    %c0_7 = arith.constant 0 : index
    %7 = vector.load %arg2[%c1, %c0_6, %c0_7] : memref<2x8x16xf32, #tpu.memory_space<vmem>>, vector<1x8x16xf32>
    %8 = vector.shape_cast %7 : vector<1x8x16xf32> to vector<8x16xf32>
    %cst_8 = arith.constant dense<0.000000e+00> : vector<8x128xf32>
    %9 = tpu.matmul %8, %6, %cst_8 {dimension_numbers = #tpu.dot_dimension_numbers<[1], [0], [0], [1], [0, 0, 1, 1], [], []>} : vector<8x16xf32>, vector<16x128xf32>, vector<8x128xf32> -> vector<8x128xf32>
    %10 = arith.addf %5, %9 : vector<8x128xf32>
    %c0_9 = arith.constant 0 : index
    %c0_10 = arith.constant 0 : index
    %11 = vector.load %arg3[%c0_9, %c0_10] : memref<8x1xf32, #tpu.memory_space<vmem>>, vector<8x1xf32>
    %12 = vector.broadcast %11 : vector<8x1xf32> to vector<8x128xf32>
    %13 = arith.addf %10, %12 : vector<8x128xf32>
    %c0_11 = arith.constant 0 : index
    %c0_12 = arith.constant 0 : index
    %c0_13 = arith.constant 0 : index
    %14 = vector.load %arg4[%c0_11, %c0_12, %c0_13] : memref<1x8x128xf32, #tpu.memory_space<vmem>>, vector<1x8x128xf32>
    %15 = vector.shape_cast %14 : vector<1x8x128xf32> to vector<8x128xf32>
    %16 = vector.shape_cast %13 : vector<8x128xf32> to vector<1x8x128xf32>
    tpu.vector_store %arg4[%c0_11, %c0_12, %c0_13], %16 {strides = array<i32>} : memref<1x8x128xf32, #tpu.memory_space<vmem>>, vector<1x8x128xf32>,
    return
  }
  func.func @transform_0(%arg0: i32) -> (i32, i32, i32, i32) {
    %c0_i32 = arith.constant 0 : i32
    %c0_i32_0 = arith.constant 0 : i32
    %c0_i32_1 = arith.constant 0 : i32
    %c0_i32_2 = arith.constant 0 : i32
    return %arg0, %c0_i32, %c0_i32_0, %c0_i32_1 : i32, i32, i32, i32
  }
  func.func @transform_1(%arg0: i32) -> (i32, i32, i32) {
    %c0_i32 = arith.constant 0 : i32
    %c0_i32_0 = arith.constant 0 : i32
    %c0_i32_1 = arith.constant 0 : i32
    %c0_i32_2 = arith.constant 0 : i32
    return %c0_i32, %c0_i32_0, %c0_i32_1 : i32, i32, i32
  }
  func.func @transform_2(%arg0: i32) -> (i32, i32) {
    %c0_i32 = arith.constant 0 : i32
    %c0_i32_0 = arith.constant 0 : i32
    %c0_i32_1 = arith.constant 0 : i32
    return %c0_i32, %c0_i32_0 : i32, i32
  }
  func.func @transform_3(%arg0: i32) -> (i32, i32, i32) {
    %c0_i32 = arith.constant 0 : i32
    %c0_i32_0 = arith.constant 0 : i32
    %c0_i32_1 = arith.constant 0 : i32
    return %arg0, %c0_i32, %c0_i32_0 : i32, i32, i32
  }
}

</mosaic_0001>

<bundles_post_ra>
// kernel: tpu_custom_call.1
= control target key start
LH: loop header
LB: loop body
LE: loop exit
PB: predicated region body
PF: predicated region fallthrough
CT: control target
= control target key end

     0   :  { %8 = vsyncpa [#allocation3], 0  ;;  %s945_s0 = inlined_call_operand.hbm [shape: f32[2,2,8,128], index: 0, kind: input, shape index: {}]   ;;  %s946_s1 = inlined_call_operand.hbm [shape: f32[2,8,16], index: 1, kind: input, shape index: {}]   ;;  %s947_s2 = inlined_call_operand.vmem [shape: f32[8,1], index: 2, kind: input, shape index: {}]   ;;  %s948_s3 = inlined_call_operand.hbm [shape: f32[2,8,128], index: 3, kind: output, shape index: {}]  }
   0x1   :  { %10 = vsyncpa [#allocation3 + $0x1], 0 }
   0x2   :  { %11 = vsyncpa [#allocation6], 0 }
   0x3   :  { %12 = vsyncpa [#allocation4], 0 }
   0x4   :  { %14 = vsyncpa [#allocation4 + $0x1], 0  ;;  %s736_s12 = smov 0   ;;  %s738_s13 = smov 0  }
   0x5   :  { %s740_s14 = smov 0   ;;  %s742_s15 = smov 0  }
   0x6 LB: > { %s757_s16 = sadd.s32 4294967295, %s704_s15   ;;  %s462_s17 = sadd.s32 4294967294, %s704_s15   ;;  %s704_s15 = sphi %s742_s15, %s968_s15   ;;  %s700_s14 = sphi %s740_s14, %s967_s14   ;;  %s696_s13 = sphi %s738_s13, %s966_s13   ;;  %s692_s12 = sphi %s736_s12, %s965_s12  }
   0x7   : > { %p40_p0 = scmp.ne.s32.totalorder %s696_s13, %s692_s12  ;;  %p949_p1 = scmp.eq.s32.totalorder %s757_s16, 0 }
   0x8   : > { %p112_p3 = scmp.eq.s32.totalorder %s462_s17, 1  ;;  %p463_p5 = scmp.ge.s32.totalorder %s704_s15, 1 }
   0x9   : > { %p766_p4 = por %p949_p1, %p40_p0  ;;  %p119_p7 = scmp.lt.s32.totalorder %s704_s15, 3 }
   0xa   : > { %p771_p6 = por %p112_p3, %p40_p0  ;;  %s706_s21 = smov [#allocation5]  }
   0xb   : > { %s952_s18 = scalar_select %p766_p4, 1, 0 }
   0xc   : > { %s953_s19 = scalar_select %p771_p6, 1, 0 }
   0xd   : > { %p776_p8 = pnand %p463_p5, %p119_p7  ;;  %s131_s22 = sshll.u32 %s706_s21, 4  ;;  %s780_s22 = int_to_ptr.vmem [resolvable:$true] %s131_s22 }
   0xe   : > { %s792_s24 = sadd.s32 1, %s704_s15   ;;  %s27_s25 = sadd.s32 1, %s700_s14 }
   0xf   : > { %s954_s20 = scalar_select %p776_p8, 1, 0 }
  0x10   : > { %p514_p9 = pneg %p776_p8  ;;  %s24_s26 = ssub.s32 %s704_s15, %s792_s24 }
  0x11   : > { %s576_s29 = scalar_lea.hbm %s946_s1, 256 }
  0x12   : > { %p787_p11 = pnand %p514_p9, %p949_p1  ;;  %p577_p12 = scmp.ne.s32.totalorder %s946_s1, %s576_s29 }
  0x13   : > { %p583_p5 = scmp.lt.u32.totalorder %s576_s29, %s946_s1 }
  0x14   : > { %p578_p13 = pneg %p787_p11 }
  0x16   : > { %p579_p0 = pnand %p578_p13, %p577_p12 }
  0x18   : > { %p580_p3 = pneg %p579_p0 }
  0x1a   : > { %p585_p7 = pnand %p583_p5, %p580_p3 }
  0x1c   : > { %588 = shalt.err (!%p585_p7)
}
  0x1d   : > { %s589_s7 = scalar_lea.vmem %s780_s22, 256  ;;  %p597_p2 = scmp.lt.s32.totalorder %s780_s22, %s780_s22 }
  0x1e   : > { %p590_p9 = scmp.ne.s32.totalorder %s780_s22, %s589_s7  ;;  %p598_p6 = scmp.lt.s32.totalorder %s589_s7, %s589_s7 }
  0x20   : > { %p592_p10 = pnand %p590_p9, %p578_p13  ;;  %p599_p4 = por %p598_p6, %p597_p2 }
  0x22   : > { %p593_p1 = pneg %p592_p10 }
  0x24   : > { %p600_p8 = pnand %p599_p4, %p593_p1 }
  0x26   : > { %603 = shalt.err (!%p600_p8)
}
  0x27   : > { %s707_s8 = smov 128   ;;  %s708_s9 = smov 8  }
  0x28   : > { %517 = dma.hbm_to_vmem [thread:$0]  (!%p787_p11), %s946_s1, 256, %s780_s22, [#allocation6], %s707_s8, %s707_s8, %s708_s9  }
  0x29   : > { %p25_p1 = scmp.eq.s32.totalorder %s24_s26, 0  ;;  %p34_p2 = scmp.ne.s32.totalorder %s700_s14, %s696_s13 }
  0x2a   : > { %p35_p4 = scmp.eq.s32.totalorder %s704_s15, 0  ;;  %p527_p6 = scmp.lt.s32.totalorder %s704_s15, 2 }
  0x2b   : > { %s826_s17 = scalar_select %p25_p1, %s700_s14, %s27_s25  }
  0x2c   : > { %p36_p8 = por %p35_p4, %p34_p2  ;;  %p956_p10 = scmp.eq.s32.totalorder %s757_s16, 1 }
  0x2d   : > { %s148_s23 = sand.u32 1, %s700_s14   ;;  %s479_s27 = sshll.u32 %s704_s15, 8 }
  0x2e   : > { %p830_p12 = por %p956_p10, %p34_p2  ;;  %s466_s28 = sshll.u32 %s148_s23, 4 }
  0x2f   : > { %s839_s4 = scalar_lea.hbm %s945_s0, %s479_s27  ;;  %s152_s22 = scalar_lea.vmem [#allocation2], %s466_s28 }
  0x30   : > { %s159_s25 = sshll.u32 %s152_s22, 4  ;;  %p841_p11 = pnand %p527_p6, %p36_p8  ;;  %s845_s25 = int_to_ptr.vmem [resolvable:$true] %s159_s25 }
  0x31   : > { %s847_s5 = scalar_lea.sflag [#allocation3], %s148_s23  ;;  %s604_s6 = scalar_lea.hbm %s839_s4, 256 }
  0x32   : > { %p605_p13 = scmp.ne.s32.totalorder %s839_s4, %s604_s6  ;;  %p606_p0 = pneg %p841_p11 }
  0x33   : > { %s609_s11 = scalar_lea.hbm %s945_s0, 512  ;;  %p610_p7 = scmp.lt.u32.totalorder %s839_s4, %s945_s0 }
  0x34   : > { %p607_p3 = pnand %p606_p0, %p605_p13  ;;  %p611_p9 = scmp.lt.u32.totalorder %s609_s11, %s604_s6 }
  0x35   : > { %p613_p2 = scmp.lt.u32.totalorder %s604_s6, %s839_s4 }
  0x36   : > { %p608_p5 = pneg %p607_p3  ;;  %p612_p1 = por %p611_p9, %p610_p7 }
  0x38   : > { %p614_p4 = por %p613_p2, %p612_p1 }
  0x3a   : > { %p615_p6 = pnand %p614_p4, %p608_p5 }
  0x3c   : > { %618 = shalt.err (!%p615_p6)
}
  0x3d   : > { %s619_s23 = scalar_lea.vmem %s845_s25, 256  ;;  %s709_s29 = smov [#allocation2]  }
  0x3e   : > { %p620_p8 = scmp.ne.s32.totalorder %s845_s25, %s619_s23  ;;  %s624_s30 = sshll.u32 %s709_s29, 4  ;;  %s625_s30 = int_to_ptr.vmem [resolvable:$false] %s624_s30 }
  0x3f   : > { %s626_s22 = scalar_lea.vmem %s625_s30, 512  ;;  %p627_p3 = scmp.lt.s32.totalorder %s845_s25, %s625_s30 }
  0x40   : > { %p622_p10 = pnand %p620_p8, %p606_p0  ;;  %p628_p7 = scmp.lt.s32.totalorder %s626_s22, %s619_s23 }
  0x42   : > { %p623_p13 = pneg %p622_p10  ;;  %p629_p9 = por %p628_p7, %p627_p3 }
  0x44   : > { %p630_p1 = pnand %p629_p9, %p623_p13 }
  0x46   : > { %633 = shalt.err (!%p630_p1)
}
  0x47   : > { %521 = dma.hbm_to_vmem [thread:$0]  (!%p841_p11), %s839_s4, 256, %s845_s25, %s847_s5, %s707_s8, %s707_s8, %s708_s9  }
  0x48   : > { %p959_p0 = scmp.ne.s32.totalorder %s954_s20, 0 }
  0x49   : > { %s881_s6 = sand.u32 (!%p959_p0), 1, %s696_s13   ;;  %p960_p5 = scmp.ne.s32.totalorder (!%p959_p0), %s952_s18, 0 }
  0x4a   : > { %171 = sbr.rel (%p959_p0) target bundleno = 441 (0x1b9), region = 32  ;;  %s470_s7 = sshll.u32 (!%p959_p0), %s881_s6, 4 }
  0x4b   : > { %s174_s10 = scalar_lea.sflag (!%p959_p0), [#allocation3], %s881_s6  ;;  %s177_s11 = scalar_lea.vmem (!%p959_p0), [#allocation2], %s470_s7 }
  0x51   : > { %679 = dma.done.wait (%p960_p5), %s174_s10, 256  }
  0x52   : > { %681 = vsyncadd (%p960_p5), %s174_s10, 4294967040  ;;  %p961_p2 = scmp.eq.s32.totalorder %s757_s16, 0 }
  0x54   : > { %683 = dma.done.wait (%p961_p2), [#allocation6], 256   ;;  %p962_p11 = pmov %p961_p2 }
  0x55   : > { %v710_v0 = vmov 0.0|0.0   ;;  %vm711_vm0 = vmmov 0   ;;  %v712_v1 = vmov 0.0   ;;  %v713_v2 = vmov 0   ;;  %v204_v3 = vld [vmem:[%s177_s11] sm:$0xff]  ;;  %v205_v4 = vld [vmem:[%s177_s11 + $0x8] sm:$0xff] }
  0x56   : > { %685 = vsyncadd (%p962_p11), [#allocation6], 4294967040  ;;  %503 = vmatprep.subr.bf16.mxu1 %v710_v0  ;;  %500 = vmatprep.subr.bf16.mxu0 %v710_v0  ;;  %v570_v5 = vpack.i.bf16 %v205_v4, %v204_v3  ;;  %v504_v6 = vpack.c.bf16 %v205_v4, %v204_v3  ;;  %s714_s18 = smov 127   ;;  %v206_v7 = vld [vmem:[#allocation5] sm:$0xff]  ;;  %vm213_vm1 = vcmask 130048   ;;  %v212_v13 = vld [vmem:[#allocation5 + $0x8] sm:$0xff] }
  0x57   : > { %497 = vmatprep.mubr.msk.f32.mxu1 %vm711_vm0, %v712_v1  ;;  %490 = vmatprep.mubr.msk.f32.mxu0 %vm711_vm0, %v712_v1  ;;  %v360_v8 = vld [vmem:[%s947_s2] sm:$0xff]  ;;  %s472_s9 = sshll.u32 %s881_s6, 3  ;;  %s476_s4 = sshll.u32 %s757_s16, 7 }
  0x58   : > { %575 = vset.pattern.permute.xlu0 %v713_v2  ;;  %505 = vmatpush3.bf16.msra.mxu1 %v504_v6  ;;  %s203_s25 = scalar_lea.vmem [#allocation7], %s472_s9  ;;  %s901_s28 = scalar_lea.hbm %s948_s3, %s476_s4 }
  0x59   : > { %571 = vrot.lane.b32.xlu0 %v570_v5, %s714_s18  ;;  %s382_s26 = sshll.u32 %s203_s25, 4  ;;  %s369_s23 = scalar_lea.sflag [#allocation4], %s881_s6  ;;  %s903_s26 = int_to_ptr.vmem [resolvable:$true] %s382_s26 }
  0x5a   : > { %s634_s29 = scalar_lea.vmem %s903_s26, 128  ;;  %s715_s16 = smov [#allocation7]  }
  0x5b   : > { %498 = vmatmul.mubr.msk.f32.vlgmr.msra.gmra.mrb[0].mxu1 %vm213_vm1, %v206_v7  ;;  %p635_p4 = scmp.ne.s32.totalorder %s903_s26, %s634_s29  ;;  %s638_s30 = sshll.u32 %s715_s16, 4  ;;  %s639_s30 = int_to_ptr.vmem [resolvable:$false] %s638_s30 }
  0x5c   : > { %s640_s22 = scalar_lea.vmem %s639_s30, 256  ;;  %p641_p10 = scmp.lt.s32.totalorder %s903_s26, %s639_s30 }
  0x5d   : > { %363 = vperm.xlu0 %575, %v360_v8   ;;  %p636_p6 = pnand %p635_p4, %p830_p12  ;;  %p642_p13 = scmp.lt.s32.totalorder %s640_s22, %s634_s29 }
  0x5f   : > { %p637_p8 = pneg %p636_p6  ;;  %p643_p3 = por %p642_p13, %p641_p10 }
  0x61   : > { %p644_p7 = pnand %p643_p3, %p637_p8 }
  0xcb   : > { %v572_v9 = vpop.permute.xlu0 %571 }
  0xcc   : > { %v574_v10 = vunpack.i.h.bf16 %v572_v9  ;;  %v573_v11 = vunpack.i.l.bf16 %v572_v9 }
  0xce   : > { %v501_v12 = vpack.c.bf16 %v574_v10, %v573_v11 }
  0xd0   : > { %502 = vmatpush3.bf16.msra.mxu0 %v501_v12 }
  0xd3   : > { %491 = vmatmul.mubr.msk.f32.vlgmr.msra.gmra.mrb[0].mxu0 %vm213_vm1, %v212_v13 }
  0xdc   : > { %v364_v17 = vpop.permute.xlu0 %363 }
 0x12e   : > { %v356_v14 = vpop.f32.mrb[0].mxu1 }
 0x12f   : > { %v499_v15 = vpop.f32.mrb[1].mxu1 }
 0x1a6   : > { %v283_v16 = vpop.f32.mrb[0].mxu0 }
 0x1a7   : > { %v357_v18 = vadd.f32 %v356_v14, %v283_v16  ;;  %v492_v19 = vpop.f32.mrb[1].mxu0 }
 0x1a9   : > { %v366_v20 = vadd.f32 %v364_v17, %v357_v18 }
 0x1ab   : > { %367 = vst [vmem:[%s203_s25] sm:$0xff] %v366_v20 }
 0x1ac   : > { %647 = shalt.err (!%p644_p7)
}
 0x1ad   : > { %s648_s6 = scalar_lea.hbm %s901_s28, 128  ;;  %s652_s11 = scalar_lea.hbm %s948_s3, 256 }
 0x1ae   : > { %p649_p9 = scmp.ne.s32.totalorder %s901_s28, %s648_s6  ;;  %p653_p5 = scmp.lt.u32.totalorder %s901_s28, %s948_s3 }
 0x1af   : > { %p654_p2 = scmp.lt.u32.totalorder %s652_s11, %s648_s6  ;;  %p656_p4 = scmp.lt.u32.totalorder %s648_s6, %s901_s28 }
 0x1b0   : > { %p650_p1 = pnand %p649_p9, %p830_p12 }
 0x1b1   : > { %p655_p11 = por %p654_p2, %p653_p5 }
 0x1b2   : > { %p651_p0 = pneg %p650_p1 }
 0x1b3   : > { %p657_p6 = por %p656_p4, %p655_p11 }
 0x1b5   : > { %p658_p8 = pnand %p657_p6, %p651_p0 }
 0x1b7   : > { %661 = shalt.err (!%p658_p8)
}
 0x1b8   : > { %512 = dma.vmem_to_hbm [thread:$0]  (%p830_p12), %s903_s26, 128, %s901_s28, %s369_s23  }
 0x1b9 PF: > { %s394_s8 = sand.u32 1, %s692_s12   ;;  %p963_p10 = scmp.ne.s32.totalorder %s953_s19, 0 }
 0x1ba   : > { %p964_p13 = scmp.ge.s32.totalorder %s704_s15, 2  ;;  %s395_s9 = scalar_lea.sflag [#allocation4], %s394_s8 }
 0x1bc   : > { %p523_p3 = pnand %p964_p13, %p963_p10 }
 0x1be   : > { %687 = dma.done.wait (!%p523_p3), %s395_s9, 128  }
 0x1bf   : > { %689 = vsyncadd (!%p523_p3), %s395_s9, 4294967168  ;;  %p17_p7 = scmp.ge.s32.totalorder %s792_s24, 4   ;;  %s965_s12 = smov %s696_s13 }
 0x1c0   : > { %s966_s13 = smov %s700_s14  ;;  %s967_s14 = smov %s826_s17 }
 0x1c1   : > { %s968_s15 = smov %s792_s24  ;;  %19 = sbr.rel (!%p17_p7) target bundleno = 6 (0x6), region = 82 }
 0x1c8   :  { %400 = vsyncpa [#allocation3], 1 }
 0x1c9   :  { %402 = vsyncpa [#allocation3 + $0x1], 1 }
 0x1ca   :  { %403 = vsyncpa [#allocation6], 1 }
 0x1cb   :  { %404 = vsyncpa [#allocation4], 1 }
 0x1cc   :  { %406 = vsyncpa [#allocation4 + $0x1], 1 }

</bundles_post_ra>
